<compile_context>
chip_gen: v6e
topology: v6e:2x2x1
jax: 0.10.0
libtpu: 0.0.40
codegen_flags: <defaults>
</compile_context>

<pallas_src>
import jax
import jax.numpy as jnp
from jax import lax
from jax.experimental import pallas as pl
from jax.experimental.pallas import tpu as pltpu

D_IN = 16      # X_train.shape[1]
H1, H2, H3, D_OUT = 128, 256, 64, 1


def mlp_kernel(x_ref, w1_ref, b1_ref, w2_ref, b2_ref, w3_ref, b3_ref,
               w4c_ref, b4_ref, o_ref):
    bf16 = jnp.bfloat16
    # layer1 + ReLU: W1 (H1,D_IN) contracted against x (tile,D_IN) on dim 1
    # (i.e. W1 @ x^T) -> (H1, tile). f32 operands: layer1 is ~3% of the MACs,
    # keeping it f32 is free and avoids any bf16 layer on the raw input.
    h = lax.dot_general(w1_ref[...], x_ref[...],
                        dimension_numbers=(((1,), (1,)), ((), ())),
                        preferred_element_type=jnp.float32)
    h = jnp.maximum(h + b1_ref[...], 0.0)
    # layer2 + ReLU: bf16 MXU operands, f32 accumulation, f32 bias/ReLU.
    h = jnp.dot(w2_ref[...], h.astype(bf16), preferred_element_type=jnp.float32)
    h = jnp.maximum(h + b2_ref[...], 0.0)
    # dropout(p=0.2): identity in eval/inference mode.
    # TODO(synk): training-mode dropout (pltpu.prng_seed/prng_random_bits) not implemented.
    # layer3 + ReLU: bf16 MXU operands, f32 accumulation.
    h = jnp.dot(w3_ref[...], h.astype(bf16), preferred_element_type=jnp.float32)
    h = jnp.maximum(h + b3_ref[...], 0.0)
    # output layer (M=1): keep it off the MXU — VPU multiply + sublane reduce,
    # result (1, tile) is lane-dense for the store.
    o_ref[...] = jnp.sum(w4c_ref[...] * h, axis=0, keepdims=True) + b4_ref[...]


def prepare_params(params):
    """One-time conversion of PyTorch-layout f32 params into kernel layout/dtypes."""
    w1, b1, w2, b2, w3, b3, w4, b4 = params
    bf16 = jnp.bfloat16
    return (w1, b1,                       # layer1 stays f32
            w2.astype(bf16), b2,          # bf16 MXU weights, f32 bias
            w3.astype(bf16), b3,
            w4.T,                         # (H3, 1) column for the VPU epilogue
            b4)                           # (1, 1)


def regression_model_forward(x, kernel_params, *, tb_cap=4096):
    """Forward pass of RegressionModel (eval mode).

    x: (B, D_IN) float32. Returns (B, 1) float32.
    tb_cap: upper bound on the batch tile (lane width). Batches up to tb_cap run
    as a single fat grid step; larger batches are split into balanced,
    128-aligned tiles (grid >= 2 so the 'parallel' axis can shard across v7x's
    two TensorCores).
    """
    B, D = x.shape
    assert D == D_IN
    w1, b1, w2, b2, w3, b3, w4c, b4 = kernel_params

    cap = 128 * max(1, tb_cap // 128)
    Bp128 = 128 * pl.cdiv(B, 128)          # always lane-dense, even for tiny B
    if Bp128 <= cap:
        ntiles, tile = 1, Bp128
    else:
        ntiles = pl.cdiv(Bp128, cap)       # minimal #tiles at the cap ...
        tile = 128 * pl.cdiv(Bp128, 128 * ntiles)   # ... balanced & 128-aligned
    Bp = tile * ntiles
    if Bp != B:
        x = jnp.pad(x, ((0, Bp - B), (0, 0)))       # pad batch rows with zeros

    full = lambda shape: pl.BlockSpec(shape, lambda i: (0, 0))
    grid_spec = pltpu.PrefetchScalarGridSpec(
        num_scalar_prefetch=0,
        grid=(ntiles,),
        in_specs=[
            pl.BlockSpec((tile, D_IN), lambda i: (i, 0)),   # x: natural layout
            full((H1, D_IN)), full((H1, 1)),
            full((H2, H1)), full((H2, 1)),
            full((H3, H2)), full((H3, 1)),
            full((H3, D_OUT)), full((D_OUT, 1)),
        ],
        out_specs=pl.BlockSpec((D_OUT, tile), lambda i: (0, i)),
    )
    out_t = pl.pallas_call(
        mlp_kernel,
        out_shape=jax.ShapeDtypeStruct((D_OUT, Bp), jnp.float32),
        grid_spec=grid_spec,
        compiler_params=pltpu.CompilerParams(
            dimension_semantics=("parallel",)),
    )(x, w1, b1, w2, b2, w3, b3, w4c, b4)
    return out_t[:, :B].T  # (B, 1)


def init_params(key):
    """PyTorch-style uniform(-1/sqrt(fan_in), 1/sqrt(fan_in)) init.

    Weights in PyTorch layout (out_features, in_features); biases (out, 1).
    """
    dims = [(D_IN, H1), (H1, H2), (H2, H3), (H3, D_OUT)]
    params = []
    for (fan_in, fan_out) in dims:
        key, kw, kb = jax.random.split(key, 3)
        bound = 1.0 / jnp.sqrt(jnp.float32(fan_in))
        w = jax.random.uniform(kw, (fan_out, fan_in), jnp.float32, -bound, bound)
        b = jax.random.uniform(kb, (fan_out, 1), jnp.float32, -bound, bound)
        params += [w, b]
    return tuple(params)


def reference_forward_matched(x, params):
    """Reference mimicking the kernel numerics (bf16 MXU operands for layers 2/3,
    f32 accumulation, f32 bias/ReLU, VPU output reduction)."""
    w1, b1, w2, b2, w3, b3, w4, b4 = params
    bf = jnp.bfloat16
    h = jnp.dot(x, w1.T, preferred_element_type=jnp.float32) + b1.T
    h = jnp.maximum(h, 0.0)
    h = jnp.dot(h.astype(bf), w2.T.astype(bf),
                preferred_element_type=jnp.float32) + b2.T
    h = jnp.maximum(h, 0.0)
    h = jnp.dot(h.astype(bf), w3.T.astype(bf),
                preferred_element_type=jnp.float32) + b3.T
    h = jnp.maximum(h, 0.0)
    return jnp.sum(h * w4, axis=1, keepdims=True) + b4.T


def reference_forward_f32(x, params):
    """Pure-f32 module-semantics reference (PyTorch eval-mode forward)."""
    w1, b1, w2, b2, w3, b3, w4, b4 = params
    h = jnp.maximum(x @ w1.T + b1.T, 0.0)
    h = jnp.maximum(h @ w2.T + b2.T, 0.0)
    h = jnp.maximum(h @ w3.T + b3.T, 0.0)
    return h @ w4.T + b4.T


if __name__ == "__main__":
    key = jax.random.PRNGKey(0)
    key, kx1, kx2 = jax.random.split(key, 3)
    params = init_params(key)
    kparams = prepare_params(params)

    # Small batch: padded up to one lane-dense 128-wide tile, single grid step.
    B = 8
    x = jax.random.normal(kx1, (B, D_IN), jnp.float32)
    out = jax.block_until_ready(regression_model_forward(x, kparams))
    assert out.shape == (B, 1)
    ref = reference_forward_matched(x, params)
    assert jnp.allclose(out, ref, atol=2e-3, rtol=2e-3)

    # Larger, non-multiple batch with a small cap to force balanced multi-tile
    # grid (exercises padding, 128-aligned tiling and the 'parallel' axis).
    B2 = 1000
    x2 = jax.random.normal(kx2, (B2, D_IN), jnp.float32)
    out2 = jax.block_until_ready(regression_model_forward(x2, kparams, tb_cap=512))
    assert out2.shape == (B2, 1)
    ref2 = reference_forward_matched(x2, params)
    assert jnp.allclose(out2, ref2, atol=2e-3, rtol=2e-3)

    # Loose sanity check against pure-f32 module semantics (bf16 MXU casts add
    # ~1e-3 absolute error at these parameter scales).
    ref2_f32 = reference_forward_f32(x2, params)
    assert jnp.allclose(out2, ref2_f32, atol=5e-2, rtol=5e-2)

    print("KERNEL_OK")
</pallas_src>

<mosaic_0001>
module attributes {stable_mosaic.version = 11 : i64} {
  func.func @mlp_kernel(%arg0: i32, %arg1: memref<128x16xf32, #tpu.memory_space<vmem>>, %arg2: memref<128x16xf32, #tpu.memory_space<vmem>>, %arg3: memref<128x1xf32, #tpu.memory_space<vmem>>, %arg4: memref<256x128xbf16, #tpu.memory_space<vmem>>, %arg5: memref<256x1xf32, #tpu.memory_space<vmem>>, %arg6: memref<64x256xbf16, #tpu.memory_space<vmem>>, %arg7: memref<64x1xf32, #tpu.memory_space<vmem>>, %arg8: memref<64x1xf32, #tpu.memory_space<vmem>>, %arg9: memref<1x1xf32, #tpu.memory_space<vmem>>, %arg10: memref<1x128xf32, #tpu.memory_space<vmem>>) attributes {dimension_semantics = [#tpu.dimension_semantics<parallel>], iteration_bounds = array<i64: 1>, scalar_prefetch = 0 : i64, scratch_operands = 0 : i64, tpu.core_type = #tpu.core_type<tc>, window_params = [{transform_indices = @transform_0, window_bounds = array<i64: 128, 16>}, {pipeline_mode = #tpu.pipeline_mode<synchronous>, transform_indices = @transform_1, window_bounds = array<i64: 128, 16>}, {pipeline_mode = #tpu.pipeline_mode<synchronous>, transform_indices = @transform_2, window_bounds = array<i64: 128, 1>}, {pipeline_mode = #tpu.pipeline_mode<synchronous>, transform_indices = @transform_3, window_bounds = array<i64: 256, 128>}, {pipeline_mode = #tpu.pipeline_mode<synchronous>, transform_indices = @transform_4, window_bounds = array<i64: 256, 1>}, {pipeline_mode = #tpu.pipeline_mode<synchronous>, transform_indices = @transform_5, window_bounds = array<i64: 64, 256>}, {pipeline_mode = #tpu.pipeline_mode<synchronous>, transform_indices = @transform_6, window_bounds = array<i64: 64, 1>}, {pipeline_mode = #tpu.pipeline_mode<synchronous>, transform_indices = @transform_7, window_bounds = array<i64: 64, 1>}, {pipeline_mode = #tpu.pipeline_mode<synchronous>, transform_indices = @transform_8, window_bounds = array<i64: 1, 1>}, {transform_indices = @transform_9, window_bounds = array<i64: 1, 128>}]} {
    %c0 = arith.constant 0 : index
    %c0_0 = arith.constant 0 : index
    %0 = vector.load %arg2[%c0, %c0_0] : memref<128x16xf32, #tpu.memory_space<vmem>>, vector<128x16xf32>
    %c0_1 = arith.constant 0 : index
    %c0_2 = arith.constant 0 : index
    %1 = vector.load %arg1[%c0_1, %c0_2] : memref<128x16xf32, #tpu.memory_space<vmem>>, vector<128x16xf32>
    %cst = arith.constant dense<0.000000e+00> : vector<128x128xf32>
    %2 = tpu.matmul %0, %1, %cst {dimension_numbers = #tpu.dot_dimension_numbers<[1], [1], [0], [0], [0, 0, 1, 0], [], []>} : vector<128x16xf32>, vector<128x16xf32>, vector<128x128xf32> -> vector<128x128xf32>
    %c0_3 = arith.constant 0 : index
    %c0_4 = arith.constant 0 : index
    %3 = vector.load %arg3[%c0_3, %c0_4] : memref<128x1xf32, #tpu.memory_space<vmem>>, vector<128x1xf32>
    %4 = vector.broadcast %3 : vector<128x1xf32> to vector<128x128xf32>
    %5 = arith.addf %2, %4 : vector<128x128xf32>
    %cst_5 = arith.constant 0.000000e+00 : f32
    %6 = vector.broadcast %cst_5 : f32 to vector<128x128xf32>
    %7 = arith.maximumf %5, %6 : vector<128x128xf32>
    %c0_6 = arith.constant 0 : index
    %c0_7 = arith.constant 0 : index
    %8 = vector.load %arg4[%c0_6, %c0_7] : memref<256x128xbf16, #tpu.memory_space<vmem>>, vector<256x128xbf16>
    %9 = arith.truncf %7 : vector<128x128xf32> to vector<128x128xbf16>
    %cst_8 = arith.constant dense<0.000000e+00> : vector<256x128xf32>
    %10 = tpu.matmul %8, %9, %cst_8 {dimension_numbers = #tpu.dot_dimension_numbers<[1], [0], [0], [1], [0, 0, 1, 1], [], []>} : vector<256x128xbf16>, vector<128x128xbf16>, vector<256x128xf32> -> vector<256x128xf32>
    %c0_9 = arith.constant 0 : index
    %c0_10 = arith.constant 0 : index
    %11 = vector.load %arg5[%c0_9, %c0_10] : memref<256x1xf32, #tpu.memory_space<vmem>>, vector<256x1xf32>
    %12 = vector.broadcast %11 : vector<256x1xf32> to vector<256x128xf32>
    %13 = arith.addf %10, %12 : vector<256x128xf32>
    %cst_11 = arith.constant 0.000000e+00 : f32
    %14 = vector.broadcast %cst_11 : f32 to vector<256x128xf32>
    %15 = arith.maximumf %13, %14 : vector<256x128xf32>
    %c0_12 = arith.constant 0 : index
    %c0_13 = arith.constant 0 : index
    %16 = vector.load %arg6[%c0_12, %c0_13] : memref<64x256xbf16, #tpu.memory_space<vmem>>, vector<64x256xbf16>
    %17 = arith.truncf %15 : vector<256x128xf32> to vector<256x128xbf16>
    %cst_14 = arith.constant dense<0.000000e+00> : vector<64x128xf32>
    %18 = tpu.matmul %16, %17, %cst_14 {dimension_numbers = #tpu.dot_dimension_numbers<[1], [0], [0], [1], [0, 0, 1, 1], [], []>} : vector<64x256xbf16>, vector<256x128xbf16>, vector<64x128xf32> -> vector<64x128xf32>
    %c0_15 = arith.constant 0 : index
    %c0_16 = arith.constant 0 : index
    %19 = vector.load %arg7[%c0_15, %c0_16] : memref<64x1xf32, #tpu.memory_space<vmem>>, vector<64x1xf32>
    %20 = vector.broadcast %19 : vector<64x1xf32> to vector<64x128xf32>
    %21 = arith.addf %18, %20 : vector<64x128xf32>
    %cst_17 = arith.constant 0.000000e+00 : f32
    %22 = vector.broadcast %cst_17 : f32 to vector<64x128xf32>
    %23 = arith.maximumf %21, %22 : vector<64x128xf32>
    %c0_18 = arith.constant 0 : index
    %c0_19 = arith.constant 0 : index
    %24 = vector.load %arg8[%c0_18, %c0_19] : memref<64x1xf32, #tpu.memory_space<vmem>>, vector<64x1xf32>
    %25 = vector.broadcast %24 : vector<64x1xf32> to vector<64x128xf32>
    %26 = arith.mulf %25, %23 : vector<64x128xf32>
    %cst_20 = arith.constant dense<0.000000e+00> : vector<128xf32>
    %27 = vector.multi_reduction <add>, %26, %cst_20 [0] : vector<64x128xf32> to vector<128xf32>
    %28 = vector.shape_cast %27 : vector<128xf32> to vector<1x128xf32>
    %c0_21 = arith.constant 0 : index
    %c0_22 = arith.constant 0 : index
    %29 = vector.load %arg9[%c0_21, %c0_22] : memref<1x1xf32, #tpu.memory_space<vmem>>, vector<1x1xf32>
    %30 = vector.broadcast %29 : vector<1x1xf32> to vector<1x128xf32>
    %31 = arith.addf %28, %30 : vector<1x128xf32>
    %c0_23 = arith.constant 0 : index
    %c0_24 = arith.constant 0 : index
    %32 = vector.load %arg10[%c0_23, %c0_24] : memref<1x128xf32, #tpu.memory_space<vmem>>, vector<1x128xf32>
    tpu.vector_store %arg10[%c0_23, %c0_24], %31 {strides = array<i32>} : memref<1x128xf32, #tpu.memory_space<vmem>>, vector<1x128xf32>,
    return
  }
  func.func @transform_0(%arg0: i32) -> (i32, i32) {
    %c0_i32 = arith.constant 0 : i32
    %c0_i32_0 = arith.constant 0 : i32
    return %arg0, %c0_i32 : i32, i32
  }
  func.func @transform_1(%arg0: i32) -> (i32, i32) {
    %c0_i32 = arith.constant 0 : i32
    %c0_i32_0 = arith.constant 0 : i32
    %c0_i32_1 = arith.constant 0 : i32
    return %c0_i32, %c0_i32_0 : i32, i32
  }
  func.func @transform_2(%arg0: i32) -> (i32, i32) {
    %c0_i32 = arith.constant 0 : i32
    %c0_i32_0 = arith.constant 0 : i32
    %c0_i32_1 = arith.constant 0 : i32
    return %c0_i32, %c0_i32_0 : i32, i32
  }
  func.func @transform_3(%arg0: i32) -> (i32, i32) {
    %c0_i32 = arith.constant 0 : i32
    %c0_i32_0 = arith.constant 0 : i32
    %c0_i32_1 = arith.constant 0 : i32
    return %c0_i32, %c0_i32_0 : i32, i32
  }
  func.func @transform_4(%arg0: i32) -> (i32, i32) {
    %c0_i32 = arith.constant 0 : i32
    %c0_i32_0 = arith.constant 0 : i32
    %c0_i32_1 = arith.constant 0 : i32
    return %c0_i32, %c0_i32_0 : i32, i32
  }
  func.func @transform_5(%arg0: i32) -> (i32, i32) {
    %c0_i32 = arith.constant 0 : i32
    %c0_i32_0 = arith.constant 0 : i32
    %c0_i32_1 = arith.constant 0 : i32
    return %c0_i32, %c0_i32_0 : i32, i32
  }
  func.func @transform_6(%arg0: i32) -> (i32, i32) {
    %c0_i32 = arith.constant 0 : i32
    %c0_i32_0 = arith.constant 0 : i32
    %c0_i32_1 = arith.constant 0 : i32
    return %c0_i32, %c0_i32_0 : i32, i32
  }
  func.func @transform_7(%arg0: i32) -> (i32, i32) {
    %c0_i32 = arith.constant 0 : i32
    %c0_i32_0 = arith.constant 0 : i32
    %c0_i32_1 = arith.constant 0 : i32
    return %c0_i32, %c0_i32_0 : i32, i32
  }
  func.func @transform_8(%arg0: i32) -> (i32, i32) {
    %c0_i32 = arith.constant 0 : i32
    %c0_i32_0 = arith.constant 0 : i32
    %c0_i32_1 = arith.constant 0 : i32
    return %c0_i32, %c0_i32_0 : i32, i32
  }
  func.func @transform_9(%arg0: i32) -> (i32, i32) {
    %c0_i32 = arith.constant 0 : i32
    %c0_i32_0 = arith.constant 0 : i32
    return %c0_i32, %arg0 : i32, i32
  }
}

</mosaic_0001>

<bundles_post_ra>
// kernel: tpu_custom_call.1
= control target key start
LH: loop header
LB: loop body
LE: loop exit
PB: predicated region body
PF: predicated region fallthrough
CT: control target
= control target key end

     0   :  { %s2130_s0 = inlined_call_operand.vmem [shape: f32[128,16], index: 0, kind: input, shape index: {}]   ;;  %s2131_s1 = inlined_call_operand.vmem [shape: f32[128,16], index: 1, kind: input, shape index: {}]   ;;  %s2132_s2 = inlined_call_operand.vmem [shape: f32[128,1], index: 2, kind: input, shape index: {}]   ;;  %s2133_s3 = inlined_call_operand.vmem [shape: bf16[256,128], index: 3, kind: input, shape index: {}]   ;;  %s2134_s4 = inlined_call_operand.vmem [shape: f32[256,1], index: 4, kind: input, shape index: {}]   ;;  %s2135_s5 = inlined_call_operand.vmem [shape: bf16[64,256], index: 5, kind: input, shape index: {}]   ;;  %s2136_s6 = inlined_call_operand.vmem [shape: f32[64,1], index: 6, kind: input, shape index: {}]   ;;  %s2137_s7 = inlined_call_operand.vmem [shape: f32[64,1], index: 7, kind: input, shape index: {}]   ;;  %s2138_s8 = inlined_call_operand.<no memory space> [shape: f32[1,1], index: 8, kind: input, shape index: {}]   ;;  %s2139_s9 = inlined_call_operand.hbm [shape: f32[1,128], index: 9, kind: output, shape index: {}]  }
   0x1   :  { %v14_v0 = vstv %s2138_s8 }
   0x2   :  { %15 = vst [vmem:[#allocation2] sm:$0x1] %v14_v0 }
   0x3   :  { %v67_v1 = vld [vmem:[%s2130_s0 + $0x78] sm:$0xff]  ;;  %vm164_vm0 = vcmask 130048   ;;  %v66_v2 = vld [vmem:[%s2130_s0 + $0x70] sm:$0xff]  ;;  %v1549_v3 = vmov 0   ;;  %v65_v5 = vld [vmem:[%s2130_s0 + $0x68] sm:$0xff] }
   0x4   :  { %1375 = vmatprep.subr.msk.mxu0 %vm164_vm0, %v67_v1  ;;  %1497 = vset.pattern.permute.xlu0 %v1549_v3  ;;  %v82_v4 = vld [vmem:[%s2132_s2 + $0x70] sm:$0xff]  ;;  %v83_v6 = vld [vmem:[%s2132_s2 + $0x78] sm:$0xff]  ;;  %v80_v7 = vld [vmem:[%s2132_s2 + $0x60] sm:$0xff] }
   0x5   :  { %1376 = vmatpush3.xpose.msk.msra.mxu0 %vm164_vm0, %v67_v1  ;;  %1498 = vset.pattern.permute.xlu1 %v1549_v3  ;;  %v81_v8 = vld [vmem:[%s2132_s2 + $0x68] sm:$0xff]  ;;  %v64_v9 = vld [vmem:[%s2130_s0 + $0x60] sm:$0xff]  ;;  %v78_v10 = vld [vmem:[%s2132_s2 + $0x50] sm:$0xff] }
   0x6   :  { %1377 = vmatprep.subr.msk.mxu0 %vm164_vm0, %v66_v2  ;;  %156 = vperm.xlu0 %1497, %v82_v4   ;;  %v79_v11 = vld [vmem:[%s2132_s2 + $0x58] sm:$0xff]  ;;  %v36_v12 = vld [vmem:[%s2131_s1] sm:$0xff]  ;;  %v77_v15 = vld [vmem:[%s2132_s2 + $0x48] sm:$0xff] }
   0x7   :  { %146 = vperm.xlu1 %1498, %v80_v7   ;;  %v63_v13 = vld [vmem:[%s2130_s0 + $0x58] sm:$0xff]  ;;  %v76_v14 = vld [vmem:[%s2132_s2 + $0x40] sm:$0xff]  ;;  %1407 = vmatprep.mubr.msk.f32.mxu0 %vm164_vm0, %v36_v12  ;;  %v62_v16 = vld [vmem:[%s2130_s0 + $0x50] sm:$0xff] }
   0x8   :  { %v74_v17 = vld [vmem:[%s2132_s2 + $0x30] sm:$0xff]  ;;  %v75_v18 = vld [vmem:[%s2132_s2 + $0x38] sm:$0xff]  ;;  %v61_v19 = vld [vmem:[%s2130_s0 + $0x48] sm:$0xff] }
   0x9   :  { %1378 = vmatpush3.xpose.msk.msra.mxu0 %vm164_vm0, %v66_v2  ;;  %v72_v20 = vld [vmem:[%s2132_s2 + $0x20] sm:$0xff]  ;;  %v73_v21 = vld [vmem:[%s2132_s2 + $0x28] sm:$0xff]  ;;  %v70_v23 = vld [vmem:[%s2132_s2 + $0x10] sm:$0xff] }
   0xa   :  { %1379 = vmatprep.subr.msk.mxu0 %vm164_vm0, %v65_v5  ;;  %161 = vperm.xlu0 %1497, %v83_v6   ;;  %v60_v22 = vld [vmem:[%s2130_s0 + $0x40] sm:$0xff]  ;;  %v71_v24 = vld [vmem:[%s2132_s2 + $0x18] sm:$0xff]  ;;  %v69_v27 = vld [vmem:[%s2132_s2 + $0x8] sm:$0xff] }
   0xb   :  { %151 = vperm.xlu1 %1498, %v81_v8   ;;  %v59_v25 = vld [vmem:[%s2130_s0 + $0x38] sm:$0xff]  ;;  %v68_v26 = vld [vmem:[%s2132_s2] sm:$0xff]  ;;  %v58_v28 = vld [vmem:[%s2130_s0 + $0x30] sm:$0xff] }
   0xc   :  { %v492_v29 = vld [vmem:[%s2134_s4 + $0xf0] sm:$0xff]  ;;  %v493_v30 = vld [vmem:[%s2134_s4 + $0xf8] sm:$0xff]  ;;  %v57_v31 = vld [vmem:[%s2130_s0 + $0x28] sm:$0xff] }
   0xd   :  { %1380 = vmatpush3.xpose.msk.msra.mxu0 %vm164_vm0, %v65_v5  ;;  %v476_v32 = vld [vmem:[%s2134_s4 + $0x70] sm:$0xff]  ;;  %v477_v33 = vld [vmem:[%s2134_s4 + $0x78] sm:$0xff]  ;;  %v56_v34 = vld [vmem:[%s2130_s0 + $0x20] sm:$0xff] }
   0xe   :  { %1381 = vmatprep.subr.msk.mxu0 %vm164_vm0, %v64_v9  ;;  %136 = vperm.xlu0 %1497, %v78_v10   ;;  %v490_v35 = vld [vmem:[%s2134_s4 + $0xe0] sm:$0xff]  ;;  %v491_v36 = vld [vmem:[%s2134_s4 + $0xe8] sm:$0xff]  ;;  %v55_v37 = vld [vmem:[%s2130_s0 + $0x18] sm:$0xff] }
   0xf   :  { %141 = vperm.xlu1 %1498, %v79_v11   ;;  %v474_v38 = vld [vmem:[%s2134_s4 + $0x60] sm:$0xff] }
  0x11   :  { %1382 = vmatpush3.xpose.msk.msra.mxu0 %vm164_vm0, %v64_v9 }
  0x12   :  { %1383 = vmatprep.subr.msk.mxu0 %vm164_vm0, %v63_v13  ;;  %126 = vperm.xlu0 %1497, %v76_v14  }
  0x13   :  { %131 = vperm.xlu1 %1498, %v77_v15  }
  0x15   :  { %1384 = vmatpush3.xpose.msk.msra.mxu0 %vm164_vm0, %v63_v13 }
  0x16   :  { %1385 = vmatprep.subr.msk.mxu0 %vm164_vm0, %v62_v16  ;;  %116 = vperm.xlu0 %1497, %v74_v17  }
  0x17   :  { %121 = vperm.xlu1 %1498, %v75_v18  }
  0x19   :  { %1386 = vmatpush3.xpose.msk.msra.mxu0 %vm164_vm0, %v62_v16 }
  0x1a   :  { %1387 = vmatprep.subr.msk.mxu0 %vm164_vm0, %v61_v19  ;;  %106 = vperm.xlu0 %1497, %v72_v20  }
  0x1b   :  { %111 = vperm.xlu1 %1498, %v73_v21  }
  0x1d   :  { %1388 = vmatpush3.xpose.msk.msra.mxu0 %vm164_vm0, %v61_v19 }
  0x1e   :  { %1389 = vmatprep.subr.msk.mxu0 %vm164_vm0, %v60_v22  ;;  %96 = vperm.xlu0 %1497, %v70_v23  }
  0x1f   :  { %101 = vperm.xlu1 %1498, %v71_v24  }
  0x21   :  { %1390 = vmatpush3.xpose.msk.msra.mxu0 %vm164_vm0, %v60_v22 }
  0x22   :  { %1391 = vmatprep.subr.msk.mxu0 %vm164_vm0, %v59_v25  ;;  %86 = vperm.xlu0 %1497, %v68_v26  }
  0x23   :  { %91 = vperm.xlu1 %1498, %v69_v27  }
  0x25   :  { %1392 = vmatpush3.xpose.msk.msra.mxu0 %vm164_vm0, %v59_v25 }
  0x26   :  { %1393 = vmatprep.subr.msk.mxu0 %vm164_vm0, %v58_v28  ;;  %646 = vperm.xlu0 %1497, %v492_v29  }
  0x27   :  { %651 = vperm.xlu1 %1498, %v493_v30  }
  0x29   :  { %1394 = vmatpush3.xpose.msk.msra.mxu0 %vm164_vm0, %v58_v28 }
  0x2a   :  { %1395 = vmatprep.subr.msk.mxu0 %vm164_vm0, %v57_v31  ;;  %566 = vperm.xlu0 %1497, %v476_v32  }
  0x2b   :  { %571 = vperm.xlu1 %1498, %v477_v33  }
  0x2d   :  { %1396 = vmatpush3.xpose.msk.msra.mxu0 %vm164_vm0, %v57_v31 }
  0x2e   :  { %1397 = vmatprep.subr.msk.mxu0 %vm164_vm0, %v56_v34  ;;  %636 = vperm.xlu0 %1497, %v490_v35  }
  0x2f   :  { %641 = vperm.xlu1 %1498, %v491_v36  }
  0x30   :  { %16 = vsyncpa [#allocation4], 0  ;;  %v475_v39 = vld [vmem:[%s2134_s4 + $0x68] sm:$0xff]  ;;  %v54_v40 = vld [vmem:[%s2130_s0 + $0x10] sm:$0xff] }
  0x31   :  { %1398 = vmatpush3.xpose.msk.msra.mxu0 %vm164_vm0, %v56_v34  ;;  %v488_v41 = vld [vmem:[%s2134_s4 + $0xd0] sm:$0xff]  ;;  %v489_v42 = vld [vmem:[%s2134_s4 + $0xd8] sm:$0xff]  ;;  %v53_v43 = vld [vmem:[%s2130_s0 + $0x8] sm:$0xff] }
  0x32   :  { %1399 = vmatprep.subr.msk.mxu0 %vm164_vm0, %v55_v37  ;;  %556 = vperm.xlu0 %1497, %v474_v38   ;;  %v472_v44 = vld [vmem:[%s2134_s4 + $0x50] sm:$0xff]  ;;  %v473_v45 = vld [vmem:[%s2134_s4 + $0x58] sm:$0xff]  ;;  %v52_v46 = vld [vmem:[%s2130_s0] sm:$0xff] }
  0x33   :  { %561 = vperm.xlu1 %1498, %v475_v39   ;;  %v486_v47 = vld [vmem:[%s2134_s4 + $0xc0] sm:$0xff]  ;;  %v487_v48 = vld [vmem:[%s2134_s4 + $0xc8] sm:$0xff]  ;;  %v38_v52 = vld [vmem:[%s2131_s1 + $0x10] sm:$0xff] }
  0x34   :  { %v470_v49 = vld [vmem:[%s2134_s4 + $0x40] sm:$0xff]  ;;  %v37_v50 = vld [vmem:[%s2131_s1 + $0x8] sm:$0xff]  ;;  %v484_v53 = vld [vmem:[%s2134_s4 + $0xb0] sm:$0xff] }
  0x35   :  { %1400 = vmatpush3.xpose.msk.msra.mxu0 %vm164_vm0, %v55_v37  ;;  %v471_v51 = vld [vmem:[%s2134_s4 + $0x48] sm:$0xff]  ;;  %v39_v54 = vld [vmem:[%s2131_s1 + $0x18] sm:$0xff]  ;;  %v40_v56 = vld [vmem:[%s2131_s1 + $0x20] sm:$0xff] }
  0x36   :  { %1401 = vmatprep.subr.msk.mxu0 %vm164_vm0, %v54_v40  ;;  %626 = vperm.xlu0 %1497, %v488_v41   ;;  %v485_v55 = vld [vmem:[%s2134_s4 + $0xb8] sm:$0xff]  ;;  %v468_v57 = vld [vmem:[%s2134_s4 + $0x30] sm:$0xff]  ;;  %v41_v58 = vld [vmem:[%s2131_s1 + $0x28] sm:$0xff] }
  0x37   :  { %631 = vperm.xlu1 %1498, %v489_v42   ;;  %v469_v59 = vld [vmem:[%s2134_s4 + $0x38] sm:$0xff]  ;;  %v42_v60 = vld [vmem:[%s2131_s1 + $0x30] sm:$0xff]  ;;  %v482_v61 = vld [vmem:[%s2134_s4 + $0xa0] sm:$0xff] }
  0x38   :  { %v43_v62 = vld [vmem:[%s2131_s1 + $0x38] sm:$0xff]  ;;  %v483_v63 = vld [vmem:[%s2134_s4 + $0xa8] sm:$0xff]  ;;  %v44_v0 = vld [vmem:[%s2131_s1 + $0x40] sm:$0xff] }
  0x39   :  { %1402 = vmatpush3.xpose.msk.msra.mxu0 %vm164_vm0, %v54_v40  ;;  %v466_v1 = vld [vmem:[%s2134_s4 + $0x20] sm:$0xff]  ;;  %v45_v2 = vld [vmem:[%s2131_s1 + $0x48] sm:$0xff]  ;;  %v46_v4 = vld [vmem:[%s2131_s1 + $0x50] sm:$0xff] }
  0x3a   :  { %1403 = vmatprep.subr.msk.mxu0 %vm164_vm0, %v53_v43  ;;  %546 = vperm.xlu0 %1497, %v472_v44   ;;  %v467_v3 = vld [vmem:[%s2134_s4 + $0x28] sm:$0xff]  ;;  %v480_v5 = vld [vmem:[%s2134_s4 + $0x90] sm:$0xff]  ;;  %v47_v6 = vld [vmem:[%s2131_s1 + $0x58] sm:$0xff] }
  0x3b   :  { %551 = vperm.xlu1 %1498, %v473_v45   ;;  %v481_v7 = vld [vmem:[%s2134_s4 + $0x98] sm:$0xff]  ;;  %v48_v8 = vld [vmem:[%s2131_s1 + $0x60] sm:$0xff]  ;;  %v464_v9 = vld [vmem:[%s2134_s4 + $0x10] sm:$0xff] }
  0x3c   :  { %v49_v10 = vld [vmem:[%s2131_s1 + $0x68] sm:$0xff]  ;;  %v465_v11 = vld [vmem:[%s2134_s4 + $0x18] sm:$0xff]  ;;  %v50_v12 = vld [vmem:[%s2131_s1 + $0x70] sm:$0xff] }
  0x3d   :  { %1404 = vmatpush3.xpose.msk.msra.mxu0 %vm164_vm0, %v53_v43  ;;  %v478_v13 = vld [vmem:[%s2134_s4 + $0x80] sm:$0xff]  ;;  %v51_v14 = vld [vmem:[%s2131_s1 + $0x78] sm:$0xff]  ;;  %v479_v15 = vld [vmem:[%s2134_s4 + $0x88] sm:$0xff] }
  0x3e   :  { %1405 = vmatprep.subr.msk.mxu0 %vm164_vm0, %v52_v46  ;;  %616 = vperm.xlu0 %1497, %v486_v47   ;;  %v462_v16 = vld [vmem:[%s2134_s4] sm:$0xff]  ;;  %v463_v17 = vld [vmem:[%s2134_s4 + $0x8] sm:$0xff]  ;;  %v969_v20 = vld [vmem:[%s2136_s6 + $0x10] sm:$0xff] }
  0x3f   :  { %621 = vperm.xlu1 %1498, %v487_v48   ;;  %v967_v18 = vld [vmem:[%s2136_s6] sm:$0xff]  ;;  %v968_v19 = vld [vmem:[%s2136_s6 + $0x8] sm:$0xff]  ;;  %v970_v21 = vld [vmem:[%s2136_s6 + $0x18] sm:$0xff] }
  0x40   :  { %v1128_v22 = vld [vmem:[%s2137_s7] sm:$0xff]  ;;  %v1129_v23 = vld [vmem:[%s2137_s7 + $0x8] sm:$0xff]  ;;  %v1130_v25 = vld [vmem:[%s2137_s7 + $0x10] sm:$0xff] }
  0x41   :  { %1406 = vmatpush3.xpose.msk.msra.mxu0 %vm164_vm0, %v52_v46  ;;  %v971_v24 = vld [vmem:[%s2136_s6 + $0x20] sm:$0xff]  ;;  %v972_v26 = vld [vmem:[%s2136_s6 + $0x28] sm:$0xff]  ;;  %v1131_v27 = vld [vmem:[%s2137_s7 + $0x18] sm:$0xff] }
  0x42   :  { %536 = vperm.xlu0 %1497, %v470_v49   ;;  %v973_v28 = vld [vmem:[%s2136_s6 + $0x30] sm:$0xff]  ;;  %v1132_v29 = vld [vmem:[%s2137_s7 + $0x20] sm:$0xff]  ;;  %v974_v30 = vld [vmem:[%s2136_s6 + $0x38] sm:$0xff] }
  0x43   :  { %541 = vperm.xlu1 %1498, %v471_v51   ;;  %v1133_v31 = vld [vmem:[%s2137_s7 + $0x28] sm:$0xff]  ;;  %v1134_v32 = vld [vmem:[%s2137_s7 + $0x30] sm:$0xff]  ;;  %v1135_v33 = vld [vmem:[%s2137_s7 + $0x38] sm:$0xff] }
  0x44   :  { %1408 = vmatmul.mubr.msk.f32.vlgmr.msra.gmra.mxu0 %vm164_vm0, %v37_v50  ;;  %v1197_v34 = vld [vmem:[#allocation2] sm:$0x1] }
  0x45   :  { %1410 = vmatprep.mubr.msk.f32.mxu0 %vm164_vm0, %v38_v52  ;;  %v1499_v35 = vld [vmem:[%s2133_s3] sm:$0xff]  }
  0x46   :  { %606 = vperm.xlu0 %1497, %v484_v53   ;;  %1447 = vmatprep.mubr.bf16.mxu1 %v1499_v35 }
  0x47   :  { %611 = vperm.xlu1 %1498, %v485_v55  }
  0x48   :  { %1411 = vmatmul.mubr.msk.f32.gmra.mxu0 %vm164_vm0, %v39_v54 }
  0x49   :  { %1413 = vmatprep.mubr.msk.f32.mxu0 %vm164_vm0, %v40_v56 }
  0x4a   :  { %526 = vperm.xlu0 %1497, %v468_v57  }
  0x4b   :  { %531 = vperm.xlu1 %1498, %v469_v59  }
  0x4c   :  { %1414 = vmatmul.mubr.msk.f32.gmra.mxu0 %vm164_vm0, %v41_v58 }
  0x4d   :  { %1416 = vmatprep.mubr.msk.f32.mxu0 %vm164_vm0, %v42_v60 }
  0x4e   :  { %596 = vperm.xlu0 %1497, %v482_v61  }
  0x4f   :  { %601 = vperm.xlu1 %1498, %v483_v63  }
  0x50   :  { %1417 = vmatmul.mubr.msk.f32.gmra.mxu0 %vm164_vm0, %v43_v62 }
  0x51   :  { %1419 = vmatprep.mubr.msk.f32.mxu0 %vm164_vm0, %v44_v0 }
  0x52   :  { %516 = vperm.xlu0 %1497, %v466_v1  }
  0x53   :  { %521 = vperm.xlu1 %1498, %v467_v3  }
  0x54   :  { %1420 = vmatmul.mubr.msk.f32.gmra.mxu0 %vm164_vm0, %v45_v2 }
  0x55   :  { %1422 = vmatprep.mubr.msk.f32.mxu0 %vm164_vm0, %v46_v4 }
  0x56   :  { %586 = vperm.xlu0 %1497, %v480_v5  }
  0x57   :  { %591 = vperm.xlu1 %1498, %v481_v7  }
  0x58   :  { %1423 = vmatmul.mubr.msk.f32.gmra.mxu0 %vm164_vm0, %v47_v6 }
  0x59   :  { %1425 = vmatprep.mubr.msk.f32.mxu0 %vm164_vm0, %v48_v8 }
  0x5a   :  { %506 = vperm.xlu0 %1497, %v464_v9  }
  0x5b   :  { %511 = vperm.xlu1 %1498, %v465_v11  }
  0x5c   :  { %1426 = vmatmul.mubr.msk.f32.gmra.mxu0 %vm164_vm0, %v49_v10 }
  0x5d   :  { %1428 = vmatprep.mubr.msk.f32.mxu0 %vm164_vm0, %v50_v12 }
  0x5e   :  { %576 = vperm.xlu0 %1497, %v478_v13  }
  0x5f   :  { %581 = vperm.xlu1 %1498, %v479_v15  }
  0x60   :  { %1429 = vmatmul.mubr.msk.f32.gmra.mxu0 %vm164_vm0, %v51_v14 }
  0x62   :  { %496 = vperm.xlu0 %1497, %v462_v16  }
  0x63   :  { %501 = vperm.xlu1 %1498, %v463_v17  }
  0x66   :  { %977 = vperm.xlu0 %1497, %v967_v18  }
  0x67   :  { %982 = vperm.xlu1 %1498, %v968_v19  }
  0x6a   :  { %987 = vperm.xlu0 %1497, %v969_v20  }
  0x6b   :  { %992 = vperm.xlu1 %1498, %v970_v21  }
  0x6e   :  { %1138 = vperm.xlu0 %1497, %v1128_v22  }
  0x6f   :  { %1143 = vperm.xlu1 %1498, %v1129_v23  }
  0x72   :  { %997 = vperm.xlu0 %1497, %v971_v24  }
  0x73   :  { %1148 = vperm.xlu1 %1498, %v1130_v25  }
  0x76   :  { %1002 = vperm.xlu0 %1497, %v972_v26  }
  0x77   :  { %1153 = vperm.xlu1 %1498, %v1131_v27  }
  0x7a   :  { %1007 = vperm.xlu0 %1497, %v973_v28  }
  0x7b   :  { %1158 = vperm.xlu1 %1498, %v1132_v29  }
  0x7e   :  { %1012 = vperm.xlu0 %1497, %v974_v30  }
  0x7f   :  { %1163 = vperm.xlu1 %1498, %v1133_v31  }
  0x81   :  { %v157_v41 = vpop.permute.xlu0 %156 }
  0x82   :  { %1168 = vperm.xlu0 %1497, %v1134_v32   ;;  %v147_v43 = vpop.permute.xlu1 %146 }
  0x83   :  { %1173 = vperm.xlu1 %1498, %v1135_v33  }
  0x85   :  { %v162_v46 = vpop.permute.xlu0 %161 }
  0x86   :  { %1200 = vperm.xlu0 %1497, %v1197_v34   ;;  %v152_v48 = vpop.permute.xlu1 %151 }
  0x89   :  { %v137_v51 = vpop.permute.xlu0 %136 }
  0x8a   :  { %v142_v53 = vpop.permute.xlu1 %141 }
  0x8d   :  { %v127_v56 = vpop.permute.xlu0 %126 }
  0x8e   :  { %v132_v60 = vpop.permute.xlu1 %131 }
  0x91   :  { %v117_v4 = vpop.permute.xlu0 %116 }
  0x92   :  { %v122_v8 = vpop.permute.xlu1 %121 }
  0x95   :  { %v107_v14 = vpop.permute.xlu0 %106 }
  0x96   :  { %v112_v18 = vpop.permute.xlu1 %111 }
  0x99   :  { %v97_v24 = vpop.permute.xlu0 %96 }
  0x9a   :  { %v102_v27 = vpop.permute.xlu1 %101 }
  0x9d   :  { %v87_v33 = vpop.permute.xlu0 %86 }
 0x104   :  { %v1943_v36 = vpop.f32.mrf.mxu0 }
 0x106   :  { %v1945_v37 = vpop.f32.mrf.mxu0 }
 0x107   :  { %v328_v34 = vadd.f32 %v1945_v37, %v87_v33  ;;  %v1500_v37 = vld [vmem:[%s2133_s3 + $0x8] sm:$0xff]  }
 0x108   :  { %v1947_v38 = vpop.f32.mrf.mxu0 }
 0x109   :  { %v343_v31 = vadd.f32 %v1947_v38, %v102_v27  ;;  %v1501_v38 = vld [vmem:[%s2133_s3 + $0x10] sm:$0xff]  }
 0x10a   :  { %v337_v39 = vpop.f32.mrf.mxu0 }
 0x10b   :  { %v338_v28 = vadd.f32 %v337_v39, %v97_v24 }
 0x10c   :  { %v1415_v40 = vpop.f32.mrf.mxu0 }
 0x10d   :  { %v353_v25 = vadd.f32 %v1415_v40, %v112_v18  ;;  %v408_v35 = vmax.f32 %v338_v28, 0.0 }
 0x10e   :  { %v347_v42 = vpop.f32.mrf.mxu0 }
 0x10f   :  { %v348_v21 = vadd.f32 %v347_v42, %v107_v14  ;;  %v411_v32 = vmax.f32 %v353_v25, 0.0  ;;  %v92_v42 = vpop.permute.xlu1 %91  ;;  %v1517_v14 = vld [vmem:[%s2135_s5 + $0x4] ss:$8 sps:$4 sm:$0xff]  }
 0x110   :  { %v1418_v44 = vpop.f32.mrf.mxu0  ;;  %v333_v40 = vadd.f32 %v1943_v36, %v92_v42  ;;  %v1502_v36 = vld [vmem:[%s2133_s3 + $0x18] sm:$0xff]   ;;  %1087 = vmatprep.mubr.bf16.mxu0 %v1517_v14 }
 0x111   :  { %v363_v19 = vadd.f32 %v1418_v44, %v122_v8  ;;  %v410_v29 = vmax.f32 %v348_v21, 0.0  ;;  %v406_v44 = vmax.f32 %v328_v34, 0.0 }
 0x112   :  { %v357_v45 = vpop.f32.mrf.mxu0 }
 0x113   :  { %v358_v15 = vadd.f32 %v357_v45, %v117_v4  ;;  %v413_v26 = vmax.f32 %v363_v19, 0.0  ;;  %v407_v45 = vmax.f32 %v333_v40, 0.0 }
 0x114   :  { %v1421_v47 = vpop.f32.mrf.mxu0 }
 0x115   :  { %v373_v12 = vadd.f32 %v1421_v47, %v132_v60  ;;  %v412_v22 = vmax.f32 %v358_v15, 0.0  ;;  %v1503_v47 = vld [vmem:[%s2133_s3 + $0x20] sm:$0xff]   ;;  %v1999_v60 = vpop.permute.xlu1 %651 }
 0x116   :  { %v367_v49 = vpop.f32.mrf.mxu0  ;;  %v1520_v15 = vld [vmem:[%s2135_s5 + $0x24] ss:$8 sps:$4 sm:$0xff]  }
 0x117   :  { %v368_v9 = vadd.f32 %v367_v49, %v127_v56  ;;  %v415_v20 = vmax.f32 %v373_v12, 0.0  ;;  %v457_v30 = vpack.c.bf16 %v413_v26, %v412_v22  ;;  %v1505_v49 = vld [vmem:[%s2133_s3 + $0x30] sm:$0xff]   ;;  %v1512_v56 = vld [vmem:[%s2133_s3 + $0x68] sm:$0xff]  }
 0x118   :  { %v1424_v50 = vpop.f32.mrf.mxu0 }
 0x119   :  { %v383_v5 = vadd.f32 %v1424_v50, %v142_v53  ;;  %v414_v16 = vmax.f32 %v368_v9, 0.0  ;;  %v1506_v50 = vld [vmem:[%s2133_s3 + $0x38] sm:$0xff]   ;;  %v1509_v53 = vld [vmem:[%s2133_s3 + $0x50] sm:$0xff]  }
 0x11a   :  { %v377_v52 = vpop.f32.mrf.mxu0 }
 0x11b   :  { %v378_v0 = vadd.f32 %v377_v52, %v137_v51  ;;  %v417_v13 = vmax.f32 %v383_v5, 0.0  ;;  %v458_v23 = vpack.c.bf16 %v415_v20, %v414_v16  ;;  %v1507_v51 = vld [vmem:[%s2133_s3 + $0x40] sm:$0xff]   ;;  %v1508_v52 = vld [vmem:[%s2133_s3 + $0x48] sm:$0xff]  }
 0x11c   :  { %v1427_v54 = vpop.f32.mrf.mxu0 }
 0x11d   :  { %v393_v62 = vadd.f32 %v1427_v54, %v152_v48  ;;  %v416_v10 = vmax.f32 %v378_v0, 0.0  ;;  %v1504_v48 = vld [vmem:[%s2133_s3 + $0x28] sm:$0xff]   ;;  %v1510_v54 = vld [vmem:[%s2133_s3 + $0x58] sm:$0xff]  }
 0x11e   :  { %v387_v55 = vpop.f32.mrf.mxu0 }
 0x11f   :  { %v388_v58 = vadd.f32 %v387_v55, %v147_v43  ;;  %v419_v6 = vmax.f32 %v393_v62, 0.0  ;;  %v459_v17 = vpack.c.bf16 %v417_v13, %v416_v10  ;;  %v409_v43 = vmax.f32 %v343_v31, 0.0  ;;  %v1511_v55 = vld [vmem:[%s2133_s3 + $0x60] sm:$0xff]   ;;  %v2003_v62 = vpop.permute.xlu1 %571 }
 0x120   :  { %v1430_v57 = vpop.f32.mrf.mxu0 }
 0x121   :  { %v403_v59 = vadd.f32 %v1430_v57, %v162_v46  ;;  %v418_v1 = vmax.f32 %v388_v58, 0.0  ;;  %v455_v39 = vpack.c.bf16 %v409_v43, %v408_v35  ;;  %v454_v46 = vpack.c.bf16 %v407_v45, %v406_v44  ;;  %v1513_v57 = vld [vmem:[%s2133_s3 + $0x70] sm:$0xff]   ;;  %v1514_v58 = vld [vmem:[%s2133_s3 + $0x78] sm:$0xff]  }
 0x122   :  { %v397_v61 = vpop.f32.mrf.mxu0 }
 0x123   :  { %v398_v63 = vadd.f32 %v397_v61, %v157_v41  ;;  %v421_v2 = vmax.f32 %v403_v59, 0.0  ;;  %v460_v11 = vpack.c.bf16 %v419_v6, %v418_v1  ;;  %v456_v41 = vpack.c.bf16 %v411_v32, %v410_v29  ;;  %v1997_v59 = vpop.permute.xlu0 %646  ;;  %v2007_v0 = vpop.permute.xlu1 %641 }
 0x125   :  { %v420_v3 = vmax.f32 %v398_v63, 0.0 }
 0x127   :  { %v461_v7 = vpack.c.bf16 %v421_v2, %v420_v3  ;;  %v2001_v61 = vpop.permute.xlu0 %566  ;;  %v2011_v2 = vpop.permute.xlu1 %561 }
 0x129   :  { %1431 = vmatprep.subr.bf16.mxu1 %v461_v7 }
 0x12a   :  { %1432 = vmatpush3.bf16.msra.mxu1 %v461_v7 }
 0x12b   :  { %1433 = vmatprep.subr.bf16.mxu1 %v460_v11  ;;  %v2005_v63 = vpop.permute.xlu0 %636  ;;  %v2015_v4 = vpop.permute.xlu1 %631 }
 0x12e   :  { %1434 = vmatpush3.bf16.msra.mxu1 %v460_v11 }
 0x12f   :  { %1435 = vmatprep.subr.bf16.mxu1 %v459_v17  ;;  %v2009_v1 = vpop.permute.xlu0 %556  ;;  %v2019_v6 = vpop.permute.xlu1 %551 }
 0x132   :  { %1436 = vmatpush3.bf16.msra.mxu1 %v459_v17 }
 0x133   :  { %1437 = vmatprep.subr.bf16.mxu1 %v458_v23  ;;  %v2013_v3 = vpop.permute.xlu0 %626  ;;  %v2023_v8 = vpop.permute.xlu1 %621 }
 0x136   :  { %1438 = vmatpush3.bf16.msra.mxu1 %v458_v23 }
 0x137   :  { %1439 = vmatprep.subr.bf16.mxu1 %v457_v30  ;;  %v2017_v5 = vpop.permute.xlu0 %546  ;;  %v2027_v10 = vpop.permute.xlu1 %541 }
 0x13a   :  { %1440 = vmatpush3.bf16.msra.mxu1 %v457_v30 }
 0x13b   :  { %1441 = vmatprep.subr.bf16.mxu1 %v456_v41  ;;  %v2021_v7 = vpop.permute.xlu0 %616  ;;  %v2031_v12 = vpop.permute.xlu1 %611 }
 0x13e   :  { %1442 = vmatpush3.bf16.msra.mxu1 %v456_v41 }
 0x13f   :  { %1443 = vmatprep.subr.bf16.mxu1 %v455_v39  ;;  %v2025_v9 = vpop.permute.xlu0 %536  ;;  %v532_v16 = vpop.permute.xlu1 %531 }
 0x142   :  { %1444 = vmatpush3.bf16.msra.mxu1 %v455_v39 }
 0x143   :  { %1445 = vmatprep.subr.bf16.mxu1 %v454_v46  ;;  %v2029_v11 = vpop.permute.xlu0 %606  ;;  %v2041_v18 = vpop.permute.xlu1 %601 }
 0x146   :  { %1446 = vmatpush3.bf16.msra.mxu1 %v454_v46 }
 0x147   :  { %v527_v13 = vpop.permute.xlu0 %526  ;;  %v522_v20 = vpop.permute.xlu1 %521 }
 0x149   :  { %1448 = vmatmul.mubr.bf16.vlgmr.msra.gmra.mxu1 %v1500_v37 }
 0x14a   :  { %1451 = vmatprep.mubr.bf16.mxu1 %v1501_v38 }
 0x14b   :  { %v2039_v17 = vpop.permute.xlu0 %596  ;;  %v2045_v22 = vpop.permute.xlu1 %591 }
 0x14f   :  { %v517_v19 = vpop.permute.xlu0 %516  ;;  %v512_v24 = vpop.permute.xlu1 %511 }
 0x151   :  { %1452 = vmatmul.mubr.bf16.gmra.mxu1 %v1502_v36 }
 0x152   :  { %1455 = vmatprep.mubr.bf16.mxu1 %v1503_v47 }
 0x153   :  { %v2043_v21 = vpop.permute.xlu0 %586  ;;  %v2049_v26 = vpop.permute.xlu1 %581 }
 0x157   :  { %v507_v23 = vpop.permute.xlu0 %506  ;;  %v502_v34 = vpop.permute.xlu1 %501 }
 0x159   :  { %1456 = vmatmul.mubr.bf16.gmra.mxu1 %v1504_v48 }
 0x15a   :  { %1459 = vmatprep.mubr.bf16.mxu1 %v1505_v49 }
 0x15b   :  { %v2047_v25 = vpop.permute.xlu0 %576 }
 0x15f   :  { %v497_v30 = vpop.permute.xlu0 %496 }
 0x161   :  { %1460 = vmatmul.mubr.bf16.gmra.mxu1 %v1506_v50 }
 0x162   :  { %1463 = vmatprep.mubr.bf16.mxu1 %v1507_v51 }
 0x169   :  { %1464 = vmatmul.mubr.bf16.gmra.mxu1 %v1508_v52 }
 0x16a   :  { %1467 = vmatprep.mubr.bf16.mxu1 %v1509_v53 }
 0x171   :  { %1468 = vmatmul.mubr.bf16.gmra.mxu1 %v1510_v54 }
 0x172   :  { %1471 = vmatprep.mubr.bf16.mxu1 %v1511_v55 }
 0x179   :  { %1472 = vmatmul.mubr.bf16.gmra.mxu1 %v1512_v56 }
 0x17a   :  { %1475 = vmatprep.mubr.bf16.mxu1 %v1513_v57 }
 0x181   :  { %1476 = vmatmul.mubr.bf16.gmra.mxu1 %v1514_v58 }
 0x182   :  { %1103 = vmatprep.mubr.bf16.mxu1 %v1520_v15 }
 0x209   :  { %v1449_v27 = vpop.f32.mrf.mxu1 }
 0x20a   :  { %v793_v29 = vadd.f32 %v1449_v27, %v507_v23 }
 0x20b   :  { %v784_v28 = vpop.f32.mrf.mxu1 }
 0x20c   :  { %v785_v32 = vadd.f32 %v784_v28, %v497_v30  ;;  %v913_v41 = vmax.f32 %v793_v29, 0.0 }
 0x20d   :  { %v1450_v31 = vpop.f32.mrf.mxu1 }
 0x20e   :  { %v796_v33 = vadd.f32 %v1450_v31, %v512_v24  ;;  %v911_v44 = vmax.f32 %v785_v32, 0.0 }
 0x20f   :  { %v787_v35 = vpop.f32.mrf.mxu1 }
 0x210   :  { %v914_v42 = vmax.f32 %v796_v33, 0.0  ;;  %v788_v40 = vadd.f32 %v787_v35, %v502_v34 }
 0x211   :  { %v1453_v43 = vpop.f32.mrf.mxu1 }
 0x212   :  { %v2051_v39 = vpack.c.bf16 %v914_v42, %v913_v41  ;;  %v912_v45 = vmax.f32 %v788_v40, 0.0  ;;  %v809_v38 = vadd.f32 %v1453_v43, %v527_v13 }
 0x213   :  { %v800_v46 = vpop.f32.mrf.mxu1 }
 0x214   :  { %v2053_v37 = vpack.c.bf16 %v912_v45, %v911_v44  ;;  %v801_v47 = vadd.f32 %v800_v46, %v517_v19  ;;  %v917_v50 = vmax.f32 %v809_v38, 0.0 }
 0x215   :  { %v1454_v36 = vpop.f32.mrf.mxu1 }
 0x216   :  { %v812_v48 = vadd.f32 %v1454_v36, %v532_v16  ;;  %v915_v54 = vmax.f32 %v801_v47, 0.0 }
 0x217   :  { %v803_v49 = vpop.f32.mrf.mxu1 }
 0x218   :  { %v918_v51 = vmax.f32 %v812_v48, 0.0  ;;  %v804_v52 = vadd.f32 %v803_v49, %v522_v20 }
 0x219   :  { %v1457_v53 = vpop.f32.mrf.mxu1 }
 0x21a   :  { %v2055_v55 = vpack.c.bf16 %v918_v51, %v917_v50  ;;  %v916_v56 = vmax.f32 %v804_v52, 0.0 }
 0x21b   :  { %v2057_v57 = vpop.f32.mrf.mxu1 }
 0x21c   :  { %v2059_v58 = vpack.c.bf16 %v916_v56, %v915_v54 }
 0x21d   :  { %v1458_v14 = vpop.f32.mrf.mxu1 }
 0x21f   :  { %v819_v15 = vpop.f32.mrf.mxu1 }
 0x221   :  { %v1461_v23 = vpop.f32.mrf.mxu1 }
 0x222   :  { %v841_v45 = vadd.f32 %v1461_v23, %v2001_v61 }
 0x223   :  { %v832_v13 = vpop.f32.mrf.mxu1 }
 0x224   :  { %v925_v54 = vmax.f32 %v841_v45, 0.0 }
 0x225   :  { %v1462_v24 = vpop.f32.mrf.mxu1 }
 0x226   :  { %v844_v40 = vadd.f32 %v1462_v24, %v2003_v62 }
 0x227   :  { %v835_v19 = vpop.f32.mrf.mxu1 }
 0x228   :  { %v926_v47 = vmax.f32 %v844_v40, 0.0  ;;  %v836_v48 = vadd.f32 %v835_v19, %v2011_v2 }
 0x229   :  { %v2061_v16 = vpop.f32.mrf.mxu1 }
 0x22a   :  { %v958_v24 = vpack.c.bf16 %v926_v47, %v925_v54 }
 0x22b   :  { %v2063_v27 = vpop.f32.mrf.mxu1 }
 0x22d   :  { %v2065_v20 = vpop.f32.mrf.mxu1 }
 0x22f   :  { %v2067_v28 = vpop.f32.mrf.mxu1 }
 0x231   :  { %v1469_v29 = vpop.f32.mrf.mxu1 }
 0x233   :  { %v2069_v30 = vpop.f32.mrf.mxu1 }
 0x235   :  { %v1470_v31 = vpop.f32.mrf.mxu1 }
 0x237   :  { %v867_v32 = vpop.f32.mrf.mxu1 }
 0x239   :  { %v1473_v33 = vpop.f32.mrf.mxu1 }
 0x23a   :  { %v889_v61 = vadd.f32 %v1473_v33, %v2013_v3  ;;  %v876_v33 = vadd.f32 %v1470_v31, %v2031_v12 }
 0x23b   :  { %v880_v34 = vpop.f32.mrf.mxu1 }
 0x23c   :  { %v881_v3 = vadd.f32 %v880_v34, %v2021_v7 }
 0x23d   :  { %v1474_v35 = vpop.f32.mrf.mxu1 }
 0x23e   :  { %v892_v50 = vadd.f32 %v1474_v35, %v2015_v4 }
 0x23f   :  { %v883_v41 = vpop.f32.mrf.mxu1 }
 0x240   :  { %v938_v2 = vmax.f32 %v892_v50, 0.0  ;;  %v884_v19 = vadd.f32 %v883_v41, %v2023_v8 }
 0x241   :  { %v1477_v42 = vpop.f32.mrf.mxu1 }
 0x242   :  { %v905_v44 = vadd.f32 %v1477_v42, %v1997_v59  ;;  %v833_v59 = vadd.f32 %v832_v13, %v2009_v1  ;;  %v924_v42 = vmax.f32 %v836_v48, 0.0  ;;  %v937_v1 = vmax.f32 %v889_v61, 0.0 }
 0x243   :  { %v896_v43 = vpop.f32.mrf.mxu1  ;;  %v936_v41 = vmax.f32 %v884_v19, 0.0 }
 0x244   :  { %v897_v38 = vadd.f32 %v896_v43, %v2005_v63  ;;  %v941_v51 = vmax.f32 %v905_v44, 0.0  ;;  %v923_v35 = vmax.f32 %v833_v59, 0.0  ;;  %v964_v8 = vpack.c.bf16 %v938_v2, %v937_v1 }
 0x245   :  { %v1478_v46 = vpop.f32.mrf.mxu1  ;;  %v935_v43 = vmax.f32 %v881_v3, 0.0  ;;  %v934_v44 = vmax.f32 %v876_v33, 0.0 }
 0x246   :  { %v908_v36 = vadd.f32 %v1478_v46, %v1999_v60  ;;  %v939_v56 = vmax.f32 %v897_v38, 0.0  ;;  %v828_v60 = vadd.f32 %v1458_v14, %v2019_v6  ;;  %v820_v6 = vadd.f32 %v819_v15, %v2027_v10 }
 0x247   :  { %v899_v49 = vpop.f32.mrf.mxu1  ;;  %v957_v14 = vpack.c.bf16 %v924_v42, %v923_v35  ;;  %v868_v10 = vadd.f32 %v867_v32, %v2041_v18  ;;  %v963_v15 = vpack.c.bf16 %v936_v41, %v935_v43  ;;  %v857_v18 = vadd.f32 %v2061_v16, %v2043_v21 }
 0x248   :  { %v942_v52 = vmax.f32 %v908_v36, 0.0  ;;  %v900_v62 = vadd.f32 %v899_v49, %v2007_v0  ;;  %v825_v0 = vadd.f32 %v1457_v53, %v2017_v5  ;;  %v922_v13 = vmax.f32 %v828_v60, 0.0  ;;  %v983_v36 = vpop.permute.xlu1 %982 }
 0x249   :  { %v817_v5 = vadd.f32 %v2057_v57, %v2025_v9  ;;  %v873_v53 = vadd.f32 %v1469_v29, %v2029_v11  ;;  %v920_v34 = vmax.f32 %v820_v6, 0.0  ;;  %v865_v9 = vadd.f32 %v2069_v30, %v2039_v17 }
 0x24a   :  { %v966_v23 = vpack.c.bf16 %v942_v52, %v941_v51  ;;  %v940_v63 = vmax.f32 %v900_v62, 0.0  ;;  %v921_v40 = vmax.f32 %v825_v0, 0.0  ;;  %v860_v11 = vadd.f32 %v2065_v20, %v2045_v22 }
 0x24b   :  { %v919_v12 = vmax.f32 %v817_v5, 0.0  ;;  %v933_v31 = vmax.f32 %v873_v53, 0.0  ;;  %v932_v45 = vmax.f32 %v868_v10, 0.0  ;;  %v931_v32 = vmax.f32 %v865_v9, 0.0 }
 0x24c   :  { %v965_v4 = vpack.c.bf16 %v940_v63, %v939_v56  ;;  %1335 = vmatprep.subr.bf16.mxu0 %v966_v23  ;;  %1479 = vmatprep.subr.bf16.mxu1 %v966_v23  ;;  %v956_v7 = vpack.c.bf16 %v922_v13, %v921_v40  ;;  %v930_v46 = vmax.f32 %v860_v11, 0.0  ;;  %v852_v17 = vadd.f32 %v2067_v28, %v2049_v26  ;;  %v978_v28 = vpop.permute.xlu0 %977  ;;  %v993_v48 = vpop.permute.xlu1 %992 }
 0x24d   :  { %1336 = vmatpush3.bf16.msra.mxu0 %v958_v24  ;;  %1487 = vmatpush3.bf16.msra.mxu1 %v958_v24  ;;  %v955_v57 = vpack.c.bf16 %v920_v34, %v919_v12  ;;  %v962_v29 = vpack.c.bf16 %v934_v44, %v933_v31  ;;  %v961_v30 = vpack.c.bf16 %v932_v45, %v931_v32  ;;  %v929_v22 = vmax.f32 %v857_v18, 0.0 }
 0x24e   :  { %1337 = vmatprep.subr.bf16.mxu0 %v965_v4  ;;  %1480 = vmatprep.subr.bf16.mxu1 %v965_v4  ;;  %v849_v20 = vadd.f32 %v2063_v27, %v2047_v25  ;;  %v928_v21 = vmax.f32 %v852_v17, 0.0  ;;  %v1515_v25 = vld [vmem:[%s2135_s5] ss:$8 sps:$4 sm:$0xff]   ;;  %v1525_v27 = vld [vmem:[%s2135_s5 + $0x10] ss:$8 sps:$4 sm:$0xff]  }
 0x24f   :  { %v960_v38 = vpack.c.bf16 %v930_v46, %v929_v22 }
 0x250   :  { %v927_v16 = vmax.f32 %v849_v20, 0.0  ;;  %v988_v47 = vpop.permute.xlu0 %987  ;;  %v1144_v50 = vpop.permute.xlu1 %1143 }
 0x251   :  { %1338 = vmatpush3.bf16.msra.mxu0 %v957_v14  ;;  %1488 = vmatpush3.bf16.msra.mxu1 %v957_v14 }
 0x252   :  { %1339 = vmatprep.subr.bf16.mxu0 %v964_v8  ;;  %1481 = vmatprep.subr.bf16.mxu1 %v964_v8  ;;  %v959_v26 = vpack.c.bf16 %v928_v21, %v927_v16 }
 0x254   :  { %v1139_v49 = vpop.permute.xlu0 %1138  ;;  %v1149_v61 = vpop.permute.xlu1 %1148 }
 0x255   :  { %1340 = vmatpush3.bf16.msra.mxu0 %v956_v7  ;;  %1489 = vmatpush3.bf16.msra.mxu1 %v956_v7 }
 0x256   :  { %1341 = vmatprep.subr.bf16.mxu0 %v963_v15  ;;  %1482 = vmatprep.subr.bf16.mxu1 %v963_v15 }
 0x258   :  { %v998_v62 = vpop.permute.xlu0 %997  ;;  %v1154_v35 = vpop.permute.xlu1 %1153 }
 0x259   :  { %1342 = vmatpush3.bf16.msra.mxu0 %v955_v57  ;;  %1490 = vmatpush3.bf16.msra.mxu1 %v955_v57 }
 0x25a   :  { %1343 = vmatprep.subr.bf16.mxu0 %v962_v29  ;;  %1483 = vmatprep.subr.bf16.mxu1 %v962_v29 }
 0x25c   :  { %v1003_v42 = vpop.permute.xlu0 %1002  ;;  %v1159_v9 = vpop.permute.xlu1 %1158 }
 0x25d   :  { %1344 = vmatpush3.bf16.msra.mxu0 %v2055_v55  ;;  %1491 = vmatpush3.bf16.msra.mxu1 %v2055_v55  ;;  %v1518_v55 = vld [vmem:[%s2135_s5 + $0x20] ss:$8 sps:$4 sm:$0xff]  }
 0x25e   :  { %1345 = vmatprep.subr.bf16.mxu0 %v961_v30  ;;  %1484 = vmatprep.subr.bf16.mxu1 %v961_v30 }
 0x260   :  { %v1008_v5 = vpop.permute.xlu0 %1007 }
 0x261   :  { %1346 = vmatpush3.bf16.msra.mxu0 %v2059_v58  ;;  %1492 = vmatpush3.bf16.msra.mxu1 %v2059_v58  ;;  %v1521_v58 = vld [vmem:[%s2135_s5 + $0x14] ss:$8 sps:$4 sm:$0xff]  }
 0x262   :  { %1347 = vmatprep.subr.bf16.mxu0 %v960_v38  ;;  %1485 = vmatprep.subr.bf16.mxu1 %v960_v38 }
 0x264   :  { %v1013_v22 = vpop.permute.xlu0 %1012 }
 0x265   :  { %1348 = vmatpush3.bf16.msra.mxu0 %v2051_v39  ;;  %1493 = vmatpush3.bf16.msra.mxu1 %v2051_v39  ;;  %v1523_v39 = vld [vmem:[%s2135_s5 + $0x34] ss:$8 sps:$4 sm:$0xff]  }
 0x266   :  { %1349 = vmatprep.subr.bf16.mxu0 %v959_v26  ;;  %1486 = vmatprep.subr.bf16.mxu1 %v959_v26  ;;  %v1164_v26 = vpop.permute.xlu1 %1163 }
 0x269   :  { %1350 = vmatpush3.bf16.msra.mxu0 %v2053_v37  ;;  %1494 = vmatpush3.bf16.msra.mxu1 %v2053_v37  ;;  %v1526_v37 = vld [vmem:[%s2135_s5 + $0x30] ss:$8 sps:$4 sm:$0xff]   ;;  %s1550_s5 = smov [#allocation3]  }
 0x26a   :  { %s1215_s27 = sshll.u32 %s1550_s5, 4  ;;  %s1216_s27 = int_to_ptr.vmem [resolvable:$true] %s1215_s27 }
 0x26b   :  { %s1527_s28 = scalar_lea.vmem %s1216_s27, 16  ;;  %s1531_s29 = scalar_lea.vmem %s1216_s27, 32 }
 0x26c   :  { %1088 = vmatmul.mubr.bf16.vlgmr.msra.gmra.mxu0 %v1515_v25  ;;  %1104 = vmatmul.mubr.bf16.vlgmr.msra.gmra.mxu1 %v1518_v55  ;;  %p1528_p0 = scmp.ne.s32.totalorder %s1216_s27, %s1527_s28  ;;  %p1532_p1 = scmp.lt.s32.totalorder %s1216_s27, %s1216_s27 }
 0x26d   :  { %1095 = vmatprep.mubr.bf16.mxu0 %v1521_v58  ;;  %1111 = vmatprep.mubr.bf16.mxu1 %v1523_v39  ;;  %p1533_p2 = scmp.lt.s32.totalorder %s1531_s29, %s1527_s28 }
 0x26f   :  { %p1534_p3 = por %p1533_p2, %p1532_p1 }
 0x271   :  { %p1535_p4 = pnand %p1534_p3, %p1528_p0 }
 0x274   :  { %1096 = vmatmul.mubr.bf16.gmra.mxu0 %v1525_v27  ;;  %1112 = vmatmul.mubr.bf16.gmra.mxu1 %v1526_v37 }
 0x32c   :  { %v1351_v51 = vpop.f32.mrf.mxu0  ;;  %v1363_v52 = vpop.f32.mrf.mxu1 }
 0x32e   :  { %v1352_v54 = vpop.f32.mrf.mxu0  ;;  %v1364_v59 = vpop.f32.mrf.mxu1 }
 0x32f   :  { %v1353_v56 = vadd.f32 %v1352_v54, %v1351_v51  ;;  %v1365_v3 = vadd.f32 %v1364_v59, %v1363_v52  ;;  %v1203_v51 = vlaneseq }
 0x330   :  { %v1354_v23 = vpop.f32.mrf.mxu0  ;;  %v1366_v63 = vpop.f32.mrf.mxu1 }
 0x331   :  { %v1090_v19 = vadd.f32 %v1353_v56, %v978_v28  ;;  %v1106_v7 = vadd.f32 %v1365_v3, %v998_v62  ;;  %v1169_v28 = vpop.permute.xlu0 %1168  ;;  %v1204_v54 = vshrl.u32 %v1203_v51, 7 }
 0x332   :  { %v1355_v60 = vpop.f32.mrf.mxu0  ;;  %v1367_v24 = vpop.f32.mrf.mxu1 }
 0x333   :  { %v1356_v2 = vadd.f32 %v1355_v60, %v1354_v23  ;;  %v1120_v8 = vmax.f32 %v1090_v19, 0.0  ;;  %v1368_v53 = vadd.f32 %v1367_v24, %v1366_v63  ;;  %v1124_v32 = vmax.f32 %v1106_v7, 0.0 }
 0x334   :  { %v1357_v4 = vpop.f32.mrf.mxu0  ;;  %v1369_v0 = vpop.f32.mrf.mxu1  ;;  %v1205_v56 = vsub.s32 0, %v1204_v54 }
 0x335   :  { %v1093_v1 = vadd.f32 %v1356_v2, %v983_v36  ;;  %v1176_v57 = vmul.f32 %v1139_v49, %v1120_v8  ;;  %v1109_v11 = vadd.f32 %v1368_v53, %v1003_v42  ;;  %v1180_v25 = vmul.f32 %v1159_v9, %v1124_v32  ;;  %v1201_v63 = vpop.permute.xlu0 %1200 }
 0x336   :  { %v1358_v13 = vpop.f32.mrf.mxu0  ;;  %v1370_v6 = vpop.f32.mrf.mxu1  ;;  %v1206_v24 = vrot.slane %v1201_v63, %v1205_v56 }
 0x337   :  { %v1121_v14 = vmax.f32 %v1093_v1, 0.0  ;;  %v1359_v33 = vadd.f32 %v1358_v13, %v1357_v4  ;;  %v1371_v12 = vadd.f32 %v1370_v6, %v1369_v0  ;;  %v1125_v20 = vmax.f32 %v1109_v11, 0.0 }
 0x338   :  { %v1360_v41 = vpop.f32.mrf.mxu0  ;;  %v1372_v40 = vpop.f32.mrf.mxu1 }
 0x339   :  { %v1098_v43 = vadd.f32 %v1359_v33, %v988_v47  ;;  %v1177_v10 = vmul.f32 %v1144_v50, %v1121_v14  ;;  %v1114_v17 = vadd.f32 %v1371_v12, %v1008_v5  ;;  %v1181_v39 = vmul.f32 %v1164_v26, %v1125_v20 }
 0x33a   :  { %v1361_v34 = vpop.f32.mrf.mxu0  ;;  %v1373_v44 = vpop.f32.mrf.mxu1 }
 0x33b   :  { %v1122_v15 = vmax.f32 %v1098_v43, 0.0  ;;  %v1362_v31 = vadd.f32 %v1361_v34, %v1360_v41  ;;  %v1374_v18 = vadd.f32 %v1373_v44, %v1372_v40  ;;  %v1184_v46 = vadd.f32 %v1177_v10, %v1176_v57 }
 0x33c   :  { %v1126_v55 = vmax.f32 %v1114_v17, 0.0 }
 0x33d   :  { %v1178_v29 = vmul.f32 %v1149_v61, %v1122_v15  ;;  %v1101_v45 = vadd.f32 %v1362_v31, %v993_v48  ;;  %v1117_v16 = vadd.f32 %v1374_v18, %v1013_v22  ;;  %v1174_v48 = vpop.permute.xlu1 %1173 }
 0x33e   :  { %v1182_v36 = vmul.f32 %v1169_v28, %v1126_v55 }
 0x33f   :  { %v1123_v30 = vmax.f32 %v1101_v45, 0.0  ;;  %v1185_v38 = vadd.f32 %v1184_v46, %v1178_v29  ;;  %v1127_v37 = vmax.f32 %v1117_v16, 0.0 }
 0x341   :  { %v1179_v21 = vmul.f32 %v1154_v35, %v1123_v30  ;;  %v1183_v49 = vmul.f32 %v1174_v48, %v1127_v37 }
 0x343   :  { %v1186_v58 = vadd.f32 %v1185_v38, %v1179_v21 }
 0x345   :  { %v1187_v27 = vadd.f32 %v1186_v58, %v1180_v25 }
 0x347   :  { %v1188_v47 = vadd.f32 %v1187_v27, %v1181_v39 }
 0x349   :  { %v1189_v50 = vadd.f32 %v1188_v47, %v1182_v36 }
 0x34b   :  { %v1190_v52 = vadd.f32 %v1189_v50, %v1183_v49 }
 0x34d   :  { %v1191_v62 = vrot.slane %v1190_v52, 4 }
 0x34f   :  { %v1192_v59 = vadd.f32 %v1191_v62, %v1190_v52 }
 0x351   :  { %v1193_v61 = vrot.slane %v1192_v59, 2 }
 0x353   :  { %v1194_v23 = vadd.f32 %v1193_v61, %v1192_v59 }
 0x355   :  { %v1195_v60 = vrot.slane %v1194_v23, 1 }
 0x357   :  { %v1196_v42 = vadd.f32 %v1195_v60, %v1194_v23 }
 0x359   :  { %v1207_v2 = vadd.f32 %v1206_v24, %v1196_v42 }
 0x35b   :  { %1208 = vst [vmem:[#allocation3] sm:$0x1] %v1207_v2 }
 0x35c   :  { %1538 = shalt.err (!%p1535_p4)
}
 0x35d   :  { %1218 = dma.vmem_to_hbm [thread:$0]  %s1216_s27, 16, %s2139_s9, [#allocation4]  }
 0x35e   :  { %1547 = dma.done.wait [#allocation4], 16  }
 0x35f   :  { %1548 = vsyncadd [#allocation4], 4294967280 }
 0x360   :  { %1222 = vsyncpa [#allocation4], 1 }

</bundles_post_ra>
